<compile_context>
chip_gen: v7x
topology: tpu7x:2x2x1
jax: 0.10.0
libtpu: 0.0.40
codegen_flags: <defaults>
</compile_context>

<pallas_src>
import functools

import jax
import jax.numpy as jnp
from jax import lax
from jax.experimental import pallas as pl
from jax.experimental.pallas import tpu as pltpu


def _round_up(n, m):
    return ((n + m - 1) // m) * m


def _sublane_multiple(dtype):
    # f32 -> 8, bf16 -> 16, int8/fp8 -> 32 (sub-32-bit dtypes pack along sublanes).
    return {4: 8, 2: 16, 1: 32}[jnp.dtype(dtype).itemsize]


def _one_hot_row(width):
    """(1, width) f32 constant [1, 0, ..., 0].

    The leading 1 hits the bias row folded into the weight slab; the trailing
    zeros are the sublane padding of the contraction dim (exact, contributes 0).
    """
    return (lax.broadcasted_iota(jnp.int32, (1, width), 1) == 0).astype(jnp.float32)


def _lstm_cell(gates, c, H):
    # gates: (1, 4H) f32, PyTorch order (i, f, g, o); c: (1, H) f32.
    # Full-width sigmoid/tanh (one EUP pass over the whole gates vreg), then
    # narrow lane slices only for the cheap VPU combines.
    sg = jax.nn.sigmoid(gates)
    tg = jnp.tanh(gates)
    i = sg[:, 0 * H:1 * H]
    f = sg[:, 1 * H:2 * H]
    g = tg[:, 2 * H:3 * H]
    o = sg[:, 3 * H:4 * H]
    c_new = f * c + i * g
    h_new = o * jnp.tanh(c_new)
    return h_new, c_new


def _lstm_seq_kernel(
    x_ref,          # (1, 1, I)        f32       per-step input row
    state_in_ref,   # (1, 4H)          f32       packed [h0 | h1 | c0 | c1]
    w_lstm_ref,     # (d0p+d1p, 4H)    f32/bf16  [Wih0^T;Whh0^T;b0;0 | Wih1^T;Whh1^T;b1;0]
    w_fc_ref,       # (Hp, Op)         f32/bf16  [W_fc^T ; b_fc ; 0], cols zero-padded
    out_ref,        # (1, 1, Op)       f32       per-step output row (lane-dense)
    state_out_ref,  # (1, 4H)          f32       final packed state
    h0_sc, h1_sc, c0_sc, c1_sc,        # (1, H) f32 VMEM scratch, carried across steps
    *, I, H, d0p, d1p, Hp,
):
    t = pl.program_id(0)
    w_dtype = w_lstm_ref.dtype

    # Initialize the carried state from the packed input on the first step only.
    @pl.when(t == 0)
    def _():
        s = state_in_ref[...]
        h0_sc[...] = s[:, 0 * H:1 * H]
        h1_sc[...] = s[:, 1 * H:2 * H]
        c0_sc[...] = s[:, 2 * H:3 * H]
        c1_sc[...] = s[:, 3 * H:4 * H]

    x = x_ref[0].astype(jnp.float32)    # (1, I)
    h0 = h0_sc[...]
    h1 = h1_sc[...]
    c0 = c0_sc[...]
    c1 = c1_sc[...]

    # ---- layer 0: fused [x ; h0 ; 1 ; 0...] @ slab0 (bias folded into slab row) ----
    xh0 = jnp.concatenate([x, h0, _one_hot_row(d0p - (I + H))], axis=-1)      # (1, d0p)
    gates0 = jnp.dot(xh0.astype(w_dtype), w_lstm_ref[0:d0p, :],
                     preferred_element_type=jnp.float32)
    h0n, c0n = _lstm_cell(gates0, c0, H)

    # ---- layer 1 ----
    # TODO(synk): on v7x (MRB in-place accumulate) try two dots (h0n@Wih1^T + h1@Whh1^T)
    # instead of the lane concat + single fused dot; keep the fused form on v5e/v6e.
    xh1 = jnp.concatenate([h0n, h1, _one_hot_row(d1p - 2 * H)], axis=-1)      # (1, d1p)
    gates1 = jnp.dot(xh1.astype(w_dtype), w_lstm_ref[d0p:d0p + d1p, :],
                     preferred_element_type=jnp.float32)
    h1n, c1n = _lstm_cell(gates1, c1, H)

    # ---- fc head: [h1n ; 1 ; 0...] @ fc_slab (bias folded) ----
    h_aug = jnp.concatenate([h1n, _one_hot_row(Hp - H)], axis=-1)             # (1, Hp)
    out = jnp.dot(h_aug.astype(w_dtype), w_fc_ref[...],
                  preferred_element_type=jnp.float32)                          # (1, Op)
    out_ref[0] = out.astype(out_ref.dtype)

    # Carry the state to the next grid step.
    h0_sc[...] = h0n
    h1_sc[...] = h1n
    c0_sc[...] = c0n
    c1_sc[...] = c1n

    # Final packed state, written once on the last step (lane-dense single block).
    @pl.when(t == pl.num_programs(0) - 1)
    def _():
        state_out_ref[:, 0 * H:1 * H] = h0n
        state_out_ref[:, 1 * H:2 * H] = h1n
        state_out_ref[:, 2 * H:3 * H] = c0n
        state_out_ref[:, 3 * H:4 * H] = c1n


def prepare_params(params, *, weight_dtype=jnp.float32):
    """One-time parameter packing (hoisted out of the hot path).

    Packs the 10 PyTorch tensors into 2 slabs:
      w_lstm : (d0p+d1p, 4H)  rows [0:I+H)        = [W_ih_l0^T ; W_hh_l0^T]
                              row  I+H            = b_ih_l0 + b_hh_l0
                              rows [d0p:d0p+2H)   = [W_ih_l1^T ; W_hh_l1^T]
                              row  d0p+2H         = b_ih_l1 + b_hh_l1
                              (zero-padded to dtype-aware sublane multiples)
      w_fc   : (Hp, Op)       rows [0:H) = W_fc^T, row H = b_fc, cols padded to 128.
    Set weight_dtype=jnp.bfloat16 to halve weight DMA bytes (f32 MXU accumulation
    is kept inside the kernel).
    """
    I = params["w_ih_l0"].shape[1]
    H = params["w_hh_l0"].shape[1]
    O = params["w_fc"].shape[0]
    sub = _sublane_multiple(weight_dtype)

    d0, d1 = I + H + 1, 2 * H + 1
    d0p, d1p = _round_up(d0, sub), _round_up(d1, sub)
    Hp = _round_up(H + 1, sub)
    Op = _round_up(O, 128)

    w0 = jnp.concatenate(
        [params["w_ih_l0"].T, params["w_hh_l0"].T,
         (params["b_ih_l0"] + params["b_hh_l0"])[None, :]], axis=0)   # (d0, 4H)
    w1 = jnp.concatenate(
        [params["w_ih_l1"].T, params["w_hh_l1"].T,
         (params["b_ih_l1"] + params["b_hh_l1"])[None, :]], axis=0)   # (d1, 4H)
    w_lstm = jnp.zeros((d0p + d1p, 4 * H), jnp.float32)
    w_lstm = w_lstm.at[:d0].set(w0).at[d0p:d0p + d1].set(w1).astype(weight_dtype)

    w_fc = jnp.zeros((Hp, Op), jnp.float32)
    w_fc = w_fc.at[:H, :O].set(params["w_fc"].T).at[H, :O].set(params["b_fc"])
    w_fc = w_fc.astype(weight_dtype)

    return {"w_lstm": w_lstm, "w_fc": w_fc,
            "input_size": I, "hidden_size": H, "output_size": O}


@functools.partial(jax.jit, static_argnames=("output_size",))
def forward_seq(x_seq, state_in, w_lstm, w_fc, *, output_size):
    """Run T timesteps in ONE pallas_call (resident weights, state carried in VMEM).

    x_seq: (T, I) f32; state_in: (1, 4H) f32 packed [h0|h1|c0|c1].
    Returns (out_seq: (T, O) f32, state_out: (1, 4H) f32).
    """
    T, I = x_seq.shape
    H = state_in.shape[1] // 4
    Hp, Op = w_fc.shape
    sub = _sublane_multiple(w_lstm.dtype)
    d1p = _round_up(2 * H + 1, sub)
    d0p = w_lstm.shape[0] - d1p

    x3 = x_seq.reshape(T, 1, I)   # singleton mid axis keeps per-step blocks tile-legal

    kernel = functools.partial(_lstm_seq_kernel, I=I, H=H, d0p=d0p, d1p=d1p, Hp=Hp)

    flops = T * 2 * (d0p * 4 * H + d1p * 4 * H + Hp * Op) + T * 24 * H
    bytes_accessed = (
        sum(int(a.size) * a.dtype.itemsize for a in (x_seq, state_in, w_lstm, w_fc))
        + 4 * (T * Op + 4 * H))

    grid_spec = pltpu.PrefetchScalarGridSpec(
        num_scalar_prefetch=0,
        grid=(T,),
        in_specs=[
            pl.BlockSpec((1, 1, I), lambda t: (t, 0, 0)),            # per-step x row
            pl.BlockSpec((1, 4 * H), lambda t: (0, 0)),              # packed init state
            pl.BlockSpec((d0p + d1p, 4 * H), lambda t: (0, 0)),      # resident LSTM slab
            pl.BlockSpec((Hp, Op), lambda t: (0, 0)),                # resident fc slab
        ],
        out_specs=(
            pl.BlockSpec((1, 1, Op), lambda t: (t, 0, 0)),           # per-step out row
            pl.BlockSpec((1, 4 * H), lambda t: (0, 0)),              # final packed state
        ),
        scratch_shapes=[pltpu.VMEM((1, H), jnp.float32)] * 4,        # h0, h1, c0, c1
    )

    out_p, state_out = pl.pallas_call(
        kernel,
        grid_spec=grid_spec,
        out_shape=(
            jax.ShapeDtypeStruct((T, 1, Op), jnp.float32),
            jax.ShapeDtypeStruct((1, 4 * H), jnp.float32),
        ),
        input_output_aliases={1: 1},   # state_out reuses state_in's HBM buffer
        compiler_params=pltpu.CompilerParams(dimension_semantics=("arbitrary",)),
        cost_estimate=pl.CostEstimate(
            flops=flops, transcendentals=T * 18 * H, bytes_accessed=bytes_accessed),
    )(x3, state_in, w_lstm, w_fc)

    # TODO(synk): a batched (B, I)/(B, 4H) variant would fill more MXU rows and allow a
    # "parallel" axis for v7x's second TensorCore, but changes the module's batch=1 API.
    return out_p[:, 0, :output_size], state_out


def two_layer_lstm_forward(x, hidden, prep):
    """PyTorch-compatible single-step forward.

    x: (I,), hidden = (h, c) each (num_layers=2, 1, H).
    Returns (out: (O,), (h_n: (2,1,H), c_n: (2,1,H))).
    """
    h, c = hidden
    H = h.shape[-1]
    x_seq = x.reshape(1, -1).astype(jnp.float32)
    state_in = jnp.concatenate(
        [h[0, 0], h[1, 0], c[0, 0], c[1, 0]], axis=-1
    ).reshape(1, 4 * H).astype(jnp.float32)
    out_seq, state_out = forward_seq(
        x_seq, state_in, prep["w_lstm"], prep["w_fc"], output_size=prep["output_size"])
    h_n = jnp.stack([state_out[0, 0:H], state_out[0, H:2 * H]])[:, None, :]
    c_n = jnp.stack([state_out[0, 2 * H:3 * H], state_out[0, 3 * H:4 * H]])[:, None, :]
    return out_seq[0], (h_n, c_n)


def init_params(key, input_size, hidden_size, output_size):
    """Deterministic uniform(-k, k) init, k = 1/sqrt(hidden_size) (PyTorch-like)."""
    k = 1.0 / jnp.sqrt(jnp.float32(hidden_size))
    shapes = {
        "w_ih_l0": (4 * hidden_size, input_size),
        "w_hh_l0": (4 * hidden_size, hidden_size),
        "b_ih_l0": (4 * hidden_size,),
        "b_hh_l0": (4 * hidden_size,),
        "w_ih_l1": (4 * hidden_size, hidden_size),
        "w_hh_l1": (4 * hidden_size, hidden_size),
        "b_ih_l1": (4 * hidden_size,),
        "b_hh_l1": (4 * hidden_size,),
        "w_fc": (output_size, hidden_size),
        "b_fc": (output_size,),
    }
    params = {}
    for name, shape in shapes.items():
        key, sub = jax.random.split(key)
        params[name] = jax.random.uniform(
            sub, shape, dtype=jnp.float32, minval=-k, maxval=k)
    return params


def _reference_forward(x, hidden, params):
    """Pure-JAX reference of the PyTorch module (single timestep)."""
    h, c = hidden
    H = h.shape[-1]

    def step(xv, hv, cv, wih, whh, bih, bhh):
        g = wih @ xv + bih + whh @ hv + bhh
        i = jax.nn.sigmoid(g[0 * H:1 * H])
        f = jax.nn.sigmoid(g[1 * H:2 * H])
        gg = jnp.tanh(g[2 * H:3 * H])
        o = jax.nn.sigmoid(g[3 * H:4 * H])
        cn = f * cv + i * gg
        hn = o * jnp.tanh(cn)
        return hn, cn

    h0n, c0n = step(x, h[0, 0], c[0, 0],
                    params["w_ih_l0"], params["w_hh_l0"],
                    params["b_ih_l0"], params["b_hh_l0"])
    h1n, c1n = step(h0n, h[1, 0], c[1, 0],
                    params["w_ih_l1"], params["w_hh_l1"],
                    params["b_ih_l1"], params["b_hh_l1"])
    out = params["w_fc"] @ h1n + params["b_fc"]
    return out, (jnp.stack([h0n, h1n])[:, None, :], jnp.stack([c0n, c1n])[:, None, :])


if __name__ == "__main__":
    input_size = 28
    hidden_size = 32
    output_size = 28
    num_layers = 2

    key = jax.random.PRNGKey(0)
    key, kp, kx, kh, kc = jax.random.split(key, 5)

    params = init_params(kp, input_size, hidden_size, output_size)
    # One-time prep (NOT in the hot path). weight_dtype=jnp.bfloat16 halves weight
    # DMA bytes (dtype-aware sublane padding keeps the slab slices tile-aligned).
    prep = prepare_params(params, weight_dtype=jnp.float32)

    x = jax.random.normal(kx, (input_size,), dtype=jnp.float32)
    h0 = jax.random.normal(kh, (num_layers, 1, hidden_size), dtype=jnp.float32) * 0.1
    c0 = jax.random.normal(kc, (num_layers, 1, hidden_size), dtype=jnp.float32) * 0.1

    # --- single-step (PyTorch-equivalent call) vs pure-JAX reference ---
    out, (h_n, c_n) = two_layer_lstm_forward(x, (h0, c0), prep)
    jax.block_until_ready((out, h_n, c_n))

    ref_out, (ref_h, ref_c) = _reference_forward(x, (h0, c0), params)
    assert out.shape == (output_size,)
    assert h_n.shape == (num_layers, 1, hidden_size)
    assert c_n.shape == (num_layers, 1, hidden_size)
    assert jnp.allclose(out, ref_out, atol=1e-4)
    assert jnp.allclose(h_n, ref_h, atol=1e-4)
    assert jnp.allclose(c_n, ref_c, atol=1e-4)

    # --- fused T-step time loop: ONE pallas_call, weights DMA'd once ---
    T = 8
    key, ks = jax.random.split(key)
    x_seq = jax.random.normal(ks, (T, input_size), dtype=jnp.float32)
    state_in = jnp.concatenate(
        [h0[0, 0], h0[1, 0], c0[0, 0], c0[1, 0]], axis=-1).reshape(1, 4 * hidden_size)

    out_seq, state_out = forward_seq(
        x_seq, state_in, prep["w_lstm"], prep["w_fc"], output_size=output_size)
    jax.block_until_ready((out_seq, state_out))

    hid = (h0, c0)
    ref_outs = []
    for t in range(T):
        o, hid = _reference_forward(x_seq[t], hid, params)
        ref_outs.append(o)
    ref_outs = jnp.stack(ref_outs)

    assert out_seq.shape == (T, output_size)
    assert jnp.allclose(out_seq, ref_outs, atol=2e-4)
    assert jnp.allclose(state_out[0, 0:hidden_size], hid[0][0, 0], atol=2e-4)
    assert jnp.allclose(state_out[0, hidden_size:2 * hidden_size], hid[0][1, 0], atol=2e-4)
    assert jnp.allclose(state_out[0, 2 * hidden_size:3 * hidden_size], hid[1][0, 0], atol=2e-4)
    assert jnp.allclose(state_out[0, 3 * hidden_size:4 * hidden_size], hid[1][1, 0], atol=2e-4)

    print("KERNEL_OK")
</pallas_src>

<mosaic_0001>
module attributes {stable_mosaic.version = 11 : i64} {
  func.func @_lstm_seq_kernel(%arg0: i32, %arg1: memref<1x1x28xf32, #tpu.memory_space<vmem>>, %arg2: memref<1x128xf32, #tpu.memory_space<vmem>>, %arg3: memref<136x128xf32, #tpu.memory_space<vmem>>, %arg4: memref<40x128xf32, #tpu.memory_space<vmem>>, %arg5: memref<1x1x128xf32, #tpu.memory_space<vmem>>, %arg6: memref<1x128xf32, #tpu.memory_space<vmem>>, %arg7: memref<1x32xf32, #tpu.memory_space<vmem>>, %arg8: memref<1x32xf32, #tpu.memory_space<vmem>>, %arg9: memref<1x32xf32, #tpu.memory_space<vmem>>, %arg10: memref<1x32xf32, #tpu.memory_space<vmem>>) attributes {dimension_semantics = [#tpu.dimension_semantics<arbitrary>], iteration_bounds = array<i64: 1>, scalar_prefetch = 0 : i64, scratch_operands = 4 : i64, tpu.core_type = #tpu.core_type<tc>, window_params = [{transform_indices = @transform_0, window_bounds = array<i64: 1, 1, 28>}, {pipeline_mode = #tpu.pipeline_mode<synchronous>, transform_indices = @transform_1, window_bounds = array<i64: 1, 128>}, {pipeline_mode = #tpu.pipeline_mode<synchronous>, transform_indices = @transform_2, window_bounds = array<i64: 136, 128>}, {pipeline_mode = #tpu.pipeline_mode<synchronous>, transform_indices = @transform_3, window_bounds = array<i64: 40, 128>}, {transform_indices = @transform_4, window_bounds = array<i64: 1, 1, 128>}, {pipeline_mode = #tpu.pipeline_mode<synchronous>, transform_indices = @transform_5, window_bounds = array<i64: 1, 128>}]} {
    %c0_i32 = arith.constant 0 : i32
    %0 = arith.cmpi eq, %arg0, %c0_i32 : i32
    %1 = arith.extui %0 : i1 to i32
    %c0_i32_0 = arith.constant 0 : i32
    %2 = arith.cmpi ne, %1, %c0_i32_0 : i32
    scf.if %2 {
      %c0_36 = arith.constant 0 : index
      %c0_37 = arith.constant 0 : index
      %73 = vector.load %arg2[%c0_36, %c0_37] : memref<1x128xf32, #tpu.memory_space<vmem>>, vector<1x128xf32>
      %74 = vector.extract_strided_slice %73 {offsets = [0, 0], sizes = [1, 32], strides = [1, 1]} : vector<1x128xf32> to vector<1x32xf32>
      %c0_38 = arith.constant 0 : index
      %c0_39 = arith.constant 0 : index
      %75 = vector.load %arg7[%c0_38, %c0_39] : memref<1x32xf32, #tpu.memory_space<vmem>>, vector<1x32xf32>
      tpu.vector_store %arg7[%c0_38, %c0_39], %74 {strides = array<i32>} : memref<1x32xf32, #tpu.memory_space<vmem>>, vector<1x32xf32>,
      %76 = vector.extract_strided_slice %73 {offsets = [0, 32], sizes = [1, 32], strides = [1, 1]} : vector<1x128xf32> to vector<1x32xf32>
      %c0_40 = arith.constant 0 : index
      %c0_41 = arith.constant 0 : index
      %77 = vector.load %arg8[%c0_40, %c0_41] : memref<1x32xf32, #tpu.memory_space<vmem>>, vector<1x32xf32>
      tpu.vector_store %arg8[%c0_40, %c0_41], %76 {strides = array<i32>} : memref<1x32xf32, #tpu.memory_space<vmem>>, vector<1x32xf32>,
      %78 = vector.extract_strided_slice %73 {offsets = [0, 64], sizes = [1, 32], strides = [1, 1]} : vector<1x128xf32> to vector<1x32xf32>
      %c0_42 = arith.constant 0 : index
      %c0_43 = arith.constant 0 : index
      %79 = vector.load %arg9[%c0_42, %c0_43] : memref<1x32xf32, #tpu.memory_space<vmem>>, vector<1x32xf32>
      tpu.vector_store %arg9[%c0_42, %c0_43], %78 {strides = array<i32>} : memref<1x32xf32, #tpu.memory_space<vmem>>, vector<1x32xf32>,
      %80 = vector.extract_strided_slice %73 {offsets = [0, 96], sizes = [1, 32], strides = [1, 1]} : vector<1x128xf32> to vector<1x32xf32>
      %c0_44 = arith.constant 0 : index
      %c0_45 = arith.constant 0 : index
      %81 = vector.load %arg10[%c0_44, %c0_45] : memref<1x32xf32, #tpu.memory_space<vmem>>, vector<1x32xf32>
      tpu.vector_store %arg10[%c0_44, %c0_45], %80 {strides = array<i32>} : memref<1x32xf32, #tpu.memory_space<vmem>>, vector<1x32xf32>,
    } else {
    }
    %c0 = arith.constant 0 : index
    %c0_1 = arith.constant 0 : index
    %c0_2 = arith.constant 0 : index
    %3 = vector.load %arg1[%c0, %c0_1, %c0_2] : memref<1x1x28xf32, #tpu.memory_space<vmem>>, vector<1x1x28xf32>
    %4 = vector.shape_cast %3 : vector<1x1x28xf32> to vector<1x28xf32>
    %c0_3 = arith.constant 0 : index
    %c0_4 = arith.constant 0 : index
    %5 = vector.load %arg7[%c0_3, %c0_4] : memref<1x32xf32, #tpu.memory_space<vmem>>, vector<1x32xf32>
    %c0_5 = arith.constant 0 : index
    %c0_6 = arith.constant 0 : index
    %6 = vector.load %arg8[%c0_5, %c0_6] : memref<1x32xf32, #tpu.memory_space<vmem>>, vector<1x32xf32>
    %c0_7 = arith.constant 0 : index
    %c0_8 = arith.constant 0 : index
    %7 = vector.load %arg9[%c0_7, %c0_8] : memref<1x32xf32, #tpu.memory_space<vmem>>, vector<1x32xf32>
    %c0_9 = arith.constant 0 : index
    %c0_10 = arith.constant 0 : index
    %8 = vector.load %arg10[%c0_9, %c0_10] : memref<1x32xf32, #tpu.memory_space<vmem>>, vector<1x32xf32>
    %9 = tpu.iota {dimensions = array<i32: 1>} : vector<1x4xi32>
    %c0_i32_11 = arith.constant 0 : i32
    %10 = vector.broadcast %c0_i32_11 : i32 to vector<1x4xi32>
    %11 = arith.cmpi eq, %9, %10 : vector<1x4xi32>
    %12 = arith.extui %11 : vector<1x4xi1> to vector<1x4xi32>
    %13 = arith.sitofp %12 : vector<1x4xi32> to vector<1x4xf32>
    %14 = tpu.concatenate %4, %5, %13 in 1 : vector<1x28xf32>, vector<1x32xf32>, vector<1x4xf32> -> vector<1x64xf32>
    %c0_12 = arith.constant 0 : index
    %c0_13 = arith.constant 0 : index
    %15 = vector.load %arg3[%c0_12, %c0_13] : memref<136x128xf32, #tpu.memory_space<vmem>>, vector<64x128xf32>
    %cst = arith.constant dense<0.000000e+00> : vector<1x128xf32>
    %16 = tpu.matmul %14, %15, %cst {dimension_numbers = #tpu.dot_dimension_numbers<[1], [0], [0], [1], [0, 0, 1, 1], [], []>} : vector<1x64xf32>, vector<64x128xf32>, vector<1x128xf32> -> vector<1x128xf32>
    %17 = arith.negf %16 : vector<1x128xf32>
    %18 = math.exp %17 : vector<1x128xf32>
    %cst_14 = arith.constant 1.000000e+00 : f32
    %19 = vector.broadcast %cst_14 : f32 to vector<1x128xf32>
    %20 = arith.addf %19, %18 : vector<1x128xf32>
    %21 = arith.divf %19, %20 : vector<1x128xf32>
    %22 = math.tanh %16 : vector<1x128xf32>
    %23 = vector.extract_strided_slice %21 {offsets = [0, 0], sizes = [1, 32], strides = [1, 1]} : vector<1x128xf32> to vector<1x32xf32>
    %24 = vector.extract_strided_slice %21 {offsets = [0, 32], sizes = [1, 32], strides = [1, 1]} : vector<1x128xf32> to vector<1x32xf32>
    %25 = vector.extract_strided_slice %22 {offsets = [0, 64], sizes = [1, 32], strides = [1, 1]} : vector<1x128xf32> to vector<1x32xf32>
    %26 = vector.extract_strided_slice %21 {offsets = [0, 96], sizes = [1, 32], strides = [1, 1]} : vector<1x128xf32> to vector<1x32xf32>
    %27 = arith.mulf %24, %7 : vector<1x32xf32>
    %28 = arith.mulf %23, %25 : vector<1x32xf32>
    %29 = arith.addf %27, %28 : vector<1x32xf32>
    %30 = math.tanh %29 : vector<1x32xf32>
    %31 = arith.mulf %26, %30 : vector<1x32xf32>
    %32 = tpu.iota {dimensions = array<i32: 1>} : vector<1x8xi32>
    %c0_i32_15 = arith.constant 0 : i32
    %33 = vector.broadcast %c0_i32_15 : i32 to vector<1x8xi32>
    %34 = arith.cmpi eq, %32, %33 : vector<1x8xi32>
    %35 = arith.extui %34 : vector<1x8xi1> to vector<1x8xi32>
    %36 = arith.sitofp %35 : vector<1x8xi32> to vector<1x8xf32>
    %37 = tpu.concatenate %31, %6, %36 in 1 : vector<1x32xf32>, vector<1x32xf32>, vector<1x8xf32> -> vector<1x72xf32>
    %c64 = arith.constant 64 : index
    %c0_16 = arith.constant 0 : index
    %38 = vector.load %arg3[%c64, %c0_16] : memref<136x128xf32, #tpu.memory_space<vmem>>, vector<72x128xf32>
    %cst_17 = arith.constant dense<0.000000e+00> : vector<1x128xf32>
    %39 = tpu.matmul %37, %38, %cst_17 {dimension_numbers = #tpu.dot_dimension_numbers<[1], [0], [0], [1], [0, 0, 1, 1], [], []>} : vector<1x72xf32>, vector<72x128xf32>, vector<1x128xf32> -> vector<1x128xf32>
    %40 = arith.negf %39 : vector<1x128xf32>
    %41 = math.exp %40 : vector<1x128xf32>
    %cst_18 = arith.constant 1.000000e+00 : f32
    %42 = vector.broadcast %cst_18 : f32 to vector<1x128xf32>
    %43 = arith.addf %42, %41 : vector<1x128xf32>
    %44 = arith.divf %42, %43 : vector<1x128xf32>
    %45 = math.tanh %39 : vector<1x128xf32>
    %46 = vector.extract_strided_slice %44 {offsets = [0, 0], sizes = [1, 32], strides = [1, 1]} : vector<1x128xf32> to vector<1x32xf32>
    %47 = vector.extract_strided_slice %44 {offsets = [0, 32], sizes = [1, 32], strides = [1, 1]} : vector<1x128xf32> to vector<1x32xf32>
    %48 = vector.extract_strided_slice %45 {offsets = [0, 64], sizes = [1, 32], strides = [1, 1]} : vector<1x128xf32> to vector<1x32xf32>
    %49 = vector.extract_strided_slice %44 {offsets = [0, 96], sizes = [1, 32], strides = [1, 1]} : vector<1x128xf32> to vector<1x32xf32>
    %50 = arith.mulf %47, %8 : vector<1x32xf32>
    %51 = arith.mulf %46, %48 : vector<1x32xf32>
    %52 = arith.addf %50, %51 : vector<1x32xf32>
    %53 = math.tanh %52 : vector<1x32xf32>
    %54 = arith.mulf %49, %53 : vector<1x32xf32>
    %55 = tpu.iota {dimensions = array<i32: 1>} : vector<1x8xi32>
    %c0_i32_19 = arith.constant 0 : i32
    %56 = vector.broadcast %c0_i32_19 : i32 to vector<1x8xi32>
    %57 = arith.cmpi eq, %55, %56 : vector<1x8xi32>
    %58 = arith.extui %57 : vector<1x8xi1> to vector<1x8xi32>
    %59 = arith.sitofp %58 : vector<1x8xi32> to vector<1x8xf32>
    %60 = tpu.concatenate %54, %59 in 1 : vector<1x32xf32>, vector<1x8xf32> -> vector<1x40xf32>
    %c0_20 = arith.constant 0 : index
    %c0_21 = arith.constant 0 : index
    %61 = vector.load %arg4[%c0_20, %c0_21] : memref<40x128xf32, #tpu.memory_space<vmem>>, vector<40x128xf32>
    %cst_22 = arith.constant dense<0.000000e+00> : vector<1x128xf32>
    %62 = tpu.matmul %60, %61, %cst_22 {dimension_numbers = #tpu.dot_dimension_numbers<[1], [0], [0], [1], [0, 0, 1, 1], [], []>} : vector<1x40xf32>, vector<40x128xf32>, vector<1x128xf32> -> vector<1x128xf32>
    %c0_23 = arith.constant 0 : index
    %c0_24 = arith.constant 0 : index
    %c0_25 = arith.constant 0 : index
    %63 = vector.load %arg5[%c0_23, %c0_24, %c0_25] : memref<1x1x128xf32, #tpu.memory_space<vmem>>, vector<1x1x128xf32>
    %64 = vector.shape_cast %63 : vector<1x1x128xf32> to vector<1x128xf32>
    %65 = vector.shape_cast %62 : vector<1x128xf32> to vector<1x1x128xf32>
    tpu.vector_store %arg5[%c0_23, %c0_24, %c0_25], %65 {strides = array<i32>} : memref<1x1x128xf32, #tpu.memory_space<vmem>>, vector<1x1x128xf32>,
    %c0_26 = arith.constant 0 : index
    %c0_27 = arith.constant 0 : index
    %66 = vector.load %arg7[%c0_26, %c0_27] : memref<1x32xf32, #tpu.memory_space<vmem>>, vector<1x32xf32>
    tpu.vector_store %arg7[%c0_26, %c0_27], %31 {strides = array<i32>} : memref<1x32xf32, #tpu.memory_space<vmem>>, vector<1x32xf32>,
    %c0_28 = arith.constant 0 : index
    %c0_29 = arith.constant 0 : index
    %67 = vector.load %arg8[%c0_28, %c0_29] : memref<1x32xf32, #tpu.memory_space<vmem>>, vector<1x32xf32>
    tpu.vector_store %arg8[%c0_28, %c0_29], %54 {strides = array<i32>} : memref<1x32xf32, #tpu.memory_space<vmem>>, vector<1x32xf32>,
    %c0_30 = arith.constant 0 : index
    %c0_31 = arith.constant 0 : index
    %68 = vector.load %arg9[%c0_30, %c0_31] : memref<1x32xf32, #tpu.memory_space<vmem>>, vector<1x32xf32>
    tpu.vector_store %arg9[%c0_30, %c0_31], %29 {strides = array<i32>} : memref<1x32xf32, #tpu.memory_space<vmem>>, vector<1x32xf32>,
    %c0_32 = arith.constant 0 : index
    %c0_33 = arith.constant 0 : index
    %69 = vector.load %arg10[%c0_32, %c0_33] : memref<1x32xf32, #tpu.memory_space<vmem>>, vector<1x32xf32>
    tpu.vector_store %arg10[%c0_32, %c0_33], %52 {strides = array<i32>} : memref<1x32xf32, #tpu.memory_space<vmem>>, vector<1x32xf32>,
    %c0_i32_34 = arith.constant 0 : i32
    %70 = arith.cmpi eq, %arg0, %c0_i32_34 : i32
    %71 = arith.extui %70 : i1 to i32
    %c0_i32_35 = arith.constant 0 : i32
    %72 = arith.cmpi ne, %71, %c0_i32_35 : i32
    scf.if %72 {
      %c0_36 = arith.constant 0 : index
      %c0_37 = arith.constant 0 : index
      %73 = vector.load %arg6[%c0_36, %c0_37] : memref<1x128xf32, #tpu.memory_space<vmem>>, vector<1x32xf32>
      tpu.vector_store %arg6[%c0_36, %c0_37], %31 {strides = array<i32>} : memref<1x128xf32, #tpu.memory_space<vmem>>, vector<1x32xf32>,
      %c0_38 = arith.constant 0 : index
      %c32 = arith.constant 32 : index
      %74 = vector.load %arg6[%c0_38, %c32] : memref<1x128xf32, #tpu.memory_space<vmem>>, vector<1x32xf32>
      tpu.vector_store %arg6[%c0_38, %c32], %54 {strides = array<i32>} : memref<1x128xf32, #tpu.memory_space<vmem>>, vector<1x32xf32>,
      %c0_39 = arith.constant 0 : index
      %c64_40 = arith.constant 64 : index
      %75 = vector.load %arg6[%c0_39, %c64_40] : memref<1x128xf32, #tpu.memory_space<vmem>>, vector<1x32xf32>
      tpu.vector_store %arg6[%c0_39, %c64_40], %29 {strides = array<i32>} : memref<1x128xf32, #tpu.memory_space<vmem>>, vector<1x32xf32>,
      %c0_41 = arith.constant 0 : index
      %c96 = arith.constant 96 : index
      %76 = vector.load %arg6[%c0_41, %c96] : memref<1x128xf32, #tpu.memory_space<vmem>>, vector<1x32xf32>
      tpu.vector_store %arg6[%c0_41, %c96], %52 {strides = array<i32>} : memref<1x128xf32, #tpu.memory_space<vmem>>, vector<1x32xf32>,
    } else {
    }
    return
  }
  func.func @transform_0(%arg0: i32) -> (i32, i32, i32) {
    %c0_i32 = arith.constant 0 : i32
    %c0_i32_0 = arith.constant 0 : i32
    %c0_i32_1 = arith.constant 0 : i32
    return %arg0, %c0_i32, %c0_i32_0 : i32, i32, i32
  }
  func.func @transform_1(%arg0: i32) -> (i32, i32) {
    %c0_i32 = arith.constant 0 : i32
    %c0_i32_0 = arith.constant 0 : i32
    %c0_i32_1 = arith.constant 0 : i32
    return %c0_i32, %c0_i32_0 : i32, i32
  }
  func.func @transform_2(%arg0: i32) -> (i32, i32) {
    %c0_i32 = arith.constant 0 : i32
    %c0_i32_0 = arith.constant 0 : i32
    %c0_i32_1 = arith.constant 0 : i32
    return %c0_i32, %c0_i32_0 : i32, i32
  }
  func.func @transform_3(%arg0: i32) -> (i32, i32) {
    %c0_i32 = arith.constant 0 : i32
    %c0_i32_0 = arith.constant 0 : i32
    %c0_i32_1 = arith.constant 0 : i32
    return %c0_i32, %c0_i32_0 : i32, i32
  }
  func.func @transform_4(%arg0: i32) -> (i32, i32, i32) {
    %c0_i32 = arith.constant 0 : i32
    %c0_i32_0 = arith.constant 0 : i32
    %c0_i32_1 = arith.constant 0 : i32
    return %arg0, %c0_i32, %c0_i32_0 : i32, i32, i32
  }
  func.func @transform_5(%arg0: i32) -> (i32, i32) {
    %c0_i32 = arith.constant 0 : i32
    %c0_i32_0 = arith.constant 0 : i32
    %c0_i32_1 = arith.constant 0 : i32
    return %c0_i32, %c0_i32_0 : i32, i32
  }
}

</mosaic_0001>

<bundles_post_ra>
// kernel: forward_seq.1
= control target key start
LH: loop header
LB: loop body
LE: loop exit
PB: predicated region body
PF: predicated region fallthrough
CT: control target
= control target key end

     0   :  { %11 = vsyncpa [#allocation7], 0  ;;  %s823_s0 = inlined_call_operand.vmem [shape: f32[1,1,28], index: 0, kind: input, shape index: {}]   ;;  %s824_s1 = inlined_call_operand.vmem [shape: f32[1,128], index: 1, kind: input, shape index: {}, may-alias: {1,5}]   ;;  %s825_s2 = inlined_call_operand.hbm [shape: f32[136,128], index: 2, kind: input, shape index: {}]   ;;  %s826_s3 = inlined_call_operand.hbm [shape: f32[40,128], index: 3, kind: input, shape index: {}]   ;;  %s827_s4 = inlined_call_operand.vmem [shape: f32[1,1,128], index: 4, kind: output, shape index: {0}]   ;;  %s828_s5 = inlined_call_operand.vmem [shape: f32[1,128], index: 5, kind: output, shape index: {1}, may-alias: {1,5}]  }
   0x1   :  { %12 = vsyncpa [#allocation9], 0  ;;  %s668_s18 = smov [#allocation6]   ;;  %s620_s22 = scalar_lea.hbm %s825_s2, 2176 }
   0x2   :  { %s22_s19 = sshll.u32 %s668_s18, 4  ;;  %p621_p0 = scmp.ne.s32.totalorder %s825_s2, %s620_s22  ;;  %s23_s19 = int_to_ptr.vmem [resolvable:$true] %s22_s19 }
   0x3   :  { %p624_p1 = scmp.lt.u32.totalorder %s620_s22, %s825_s2 }
   0x5   :  { %p626_p2 = pnand %p624_p1, %p621_p0 }
   0x7   :  { %629 = shalt.err (!%p626_p2)
}
   0x8   :  { %s630_s27 = scalar_lea.vmem %s23_s19, 2176  ;;  %p635_p4 = scmp.lt.s32.totalorder %s23_s19, %s23_s19 }
   0x9   :  { %p631_p3 = scmp.ne.s32.totalorder %s23_s19, %s630_s27  ;;  %p636_p5 = scmp.lt.s32.totalorder %s630_s27, %s630_s27 }
   0xb   :  { %p637_p6 = por %p636_p5, %p635_p4 }
   0xd   :  { %p638_p7 = pnand %p637_p6, %p631_p3 }
   0xf   :  { %641 = shalt.err (!%p638_p7)
}
  0x10   :  { %s669_s28 = smov 128   ;;  %s670_s29 = smov 8  }
  0x11   :  { %28 = dma.hbm_to_vmem [thread:$0]  %s825_s2, 2176, %s23_s19, [#allocation7], %s669_s28, %s669_s28, %s670_s29  }
  0x12   :  { %s671_s7 = smov [#allocation8]   ;;  %s642_s11 = scalar_lea.hbm %s826_s3, 640 }
  0x13   :  { %s34_s8 = sshll.u32 %s671_s7, 4  ;;  %p643_p8 = scmp.ne.s32.totalorder %s826_s3, %s642_s11  ;;  %s35_s8 = int_to_ptr.vmem [resolvable:$true] %s34_s8 }
  0x14   :  { %p646_p9 = scmp.lt.u32.totalorder %s642_s11, %s826_s3 }
  0x16   :  { %p648_p10 = pnand %p646_p9, %p643_p8 }
  0x18   :  { %651 = shalt.err (!%p648_p10)
}
  0x19   :  { %s652_s16 = scalar_lea.vmem %s35_s8, 640  ;;  %p657_p12 = scmp.lt.s32.totalorder %s35_s8, %s35_s8 }
  0x1a   :  { %p653_p11 = scmp.ne.s32.totalorder %s35_s8, %s652_s16  ;;  %p658_p13 = scmp.lt.s32.totalorder %s652_s16, %s652_s16 }
  0x1c   :  { %p659_p0 = por %p658_p13, %p657_p12 }
  0x1e   :  { %p660_p1 = pnand %p659_p0, %p653_p11 }
  0x20   :  { %663 = shalt.err (!%p660_p1)
}
  0x21   :  { %40 = dma.hbm_to_vmem [thread:$0]  %s826_s3, 640, %s35_s8, [#allocation9], %s669_s28, %s669_s28, %s670_s29  }
  0x22   :  { %664 = dma.done.wait [#allocation7], 2176  }
  0x23   :  { %665 = vsyncadd [#allocation7], 4294965120 }
  0x24   :  { %666 = dma.done.wait [#allocation9], 640  }
  0x25   :  { %667 = vsyncadd [#allocation9], 4294966656  ;;  %v55_v0 = vlaneseq  ;;  %v672_v1 = vmov 0.0|0.0   ;;  %vm52_vm0 = vcmask 253952   ;;  %v51_v4 = vld [vmem:[%s824_s1] sm:$0x1] }
  0x26   :  { %562 = vmatprep.subr.bf16.mxu0 %v672_v1  ;;  %574 = vmatprep.subr.bf16.mxu1 %v672_v1  ;;  %v97_v5 = vld [vmem:[#allocation6] sm:$0xff]  ;;  %v98_v6 = vld [vmem:[#allocation6 + $0x8] sm:$0xff]  ;;  %vm673_vm1 = vmmov 0   ;;  %v674_v7 = vmov 0.0   ;;  %53 = vst.msk [vmem:[#allocation2] sm:$0x1] %vm52_vm0, %v51_v4 }
  0x27   :  { %v56_v2 = vshrl.u32 %v55_v0, 7  ;;  %525 = vmatprep.mubr.msk.f32.mxu0 %vm673_vm1, %v674_v7  ;;  %546 = vmatprep.mubr.msk.f32.mxu1 %vm673_vm1, %v674_v7  ;;  %v563_v8 = vpack.c.bf16 %v98_v6, %v97_v5  ;;  %v99_v9 = vld [vmem:[#allocation6 + $0x10] sm:$0xff]  ;;  %v100_v10 = vld [vmem:[#allocation6 + $0x18] sm:$0xff]  ;;  %v77_v12 = vand.u32 127, %v55_v0  ;;  %s675_s1 = smov 64   ;;  %v101_v14 = vld [vmem:[#allocation6 + $0x20] sm:$0xff] }
  0x28   :  { %v566_v13 = vpack.c.bf16 %v100_v10, %v99_v9  ;;  %v102_v15 = vld [vmem:[#allocation6 + $0x28] sm:$0xff]  ;;  %v103_v18 = vld [vmem:[#allocation6 + $0x30] sm:$0xff]  ;;  %v104_v19 = vld [vmem:[#allocation6 + $0x38] sm:$0xff]  ;;  %s676_s3 = smov 28   ;;  %s677_s20 = smov 60   ;;  %vm93_vm3 = vcmask 228352  }
  0x29   :  { %v57_v3 = vsub.s32 0, %v56_v2  ;;  %564 = vmatpush3.bf16.msra.mxu0 %v563_v8  ;;  %vm78_vm2 = vcmp.eq.s32.totalorder %v77_v12, 0  ;;  %v569_v16 = vpack.c.bf16 %v102_v15, %v101_v14  ;;  %v572_v21 = vpack.c.bf16 %v104_v19, %v103_v18  ;;  %v71_v24 = vld [vmem:[%s823_s0] sm:$0x1]  ;;  %s678_s23 = smov 32   ;;  %s679_s0 = smov 96  }
  0x2a   :  { %565 = vmatprep.subr.bf16.mxu0 %v672_v1  ;;  %v751_v20 = vsel %vm78_vm2, 1.0, %v674_v7  ;;  %vm95_vm4 = vcmask 490496   ;;  %vm105_vm5 = vcmask 523264   ;;  %v229_v43 = vld [vmem:[#allocation6 + $0x40] sm:$0xff]  ;;  %v230_v44 = vld [vmem:[#allocation6 + $0x48] sm:$0xff]  ;;  %v231_v45 = vld [vmem:[#allocation6 + $0x50] sm:$0xff] }
  0x2b   :  { %v744_v11 = vrot.slane %v51_v4, %v57_v3  ;;  %v575_v46 = vpack.c.bf16 %v230_v44, %v229_v43  ;;  %v232_v47 = vld [vmem:[#allocation6 + $0x58] sm:$0xff]  ;;  %v233_v49 = vld [vmem:[#allocation6 + $0x60] sm:$0xff]  ;;  %v234_v50 = vld [vmem:[#allocation6 + $0x68] sm:$0xff]  ;;  %vm226_vm6 = vcmask 261120   ;;  %vm238_vm7 = vcmask 588800  }
  0x2c   :  { %v578_v48 = vpack.c.bf16 %v232_v47, %v231_v45  ;;  %v581_v52 = vpack.c.bf16 %v234_v50, %v233_v49  ;;  %v235_v54 = vld [vmem:[#allocation6 + $0x70] sm:$0xff]  ;;  %v236_v55 = vld [vmem:[#allocation6 + $0x78] sm:$0xff]  ;;  %v237_v57 = vld [vmem:[#allocation6 + $0x80] sm:$0xff]  ;;  %vm357_vm8 = vcmask 326656   ;;  %vm452_vm9 = vcmask 516352  }
  0x2d   :  { %63 = vrot.lane.b32.xlu1 %v744_v11, %s675_s1  ;;  %567 = vmatpush3.bf16.msra.mxu0 %v566_v13  ;;  %v475_v17 = vld [vmem:[#allocation2] ss:$0 sm:$0xff]  ;;  %v584_v56 = vpack.c.bf16 %v236_v55, %v235_v54  ;;  %v352_v19 = vld [vmem:[#allocation8] sm:$0xff]  ;;  %vm457_vm10 = vcmask 778752   ;;  %vm462_vm11 = vcmask 1041152  }
  0x2e   :  { %568 = vmatprep.subr.bf16.mxu0 %v672_v1  ;;  %86 = vrot.lane.b32.xlu0 %v475_v17, %s676_s3 }
  0x2f   :  { %576 = vmatpush3.bf16.msra.mxu1 %v575_v46 }
  0x30   :  { %577 = vmatprep.subr.bf16.mxu1 %v672_v1 }
  0x31   :  { %570 = vmatpush3.bf16.msra.mxu0 %v569_v16 }
  0x32   :  { %571 = vmatprep.subr.bf16.mxu0 %v672_v1  ;;  %90 = vrot.lane.b32.xlu0 %v751_v20, %s677_s20 }
  0x33   :  { %579 = vmatpush3.bf16.msra.mxu1 %v578_v48 }
  0x34   :  { %580 = vmatprep.subr.bf16.mxu1 %v672_v1 }
  0x35   :  { %573 = vmatpush3.bf16.msra.mxu0 %v572_v21  ;;  %v353_v21 = vld [vmem:[#allocation8 + $0x8] sm:$0xff] }
  0x36   :  { %586 = vmatprep.subr.bf16.mxu0 %v672_v1 }
  0x37   :  { %582 = vmatpush3.bf16.msra.mxu1 %v581_v52 }
  0x38   :  { %583 = vmatprep.subr.bf16.mxu1 %v672_v1 }
  0x3b   :  { %585 = vmatpush3.bf16.msra.mxu1 %v584_v56 }
  0x3c   :  { %544 = vmatprep.subr.mxu1 %v674_v7 }
  0x3f   :  { %545 = vmatpush3.msra.mxu1 %v237_v57 }
  0x9f   :  { %v64_v22 = vpop.permute.xlu1 %63 }
  0xa0   :  { %66 = vst.msk [vmem:[#allocation4] sm:$0x1] %vm52_vm0, %v64_v22  ;;  %v87_v23 = vpop.permute.xlu0 %86  ;;  %v354_v22 = vld [vmem:[#allocation8 + $0x10] sm:$0xff] }
  0xa1   :  { %v94_v26 = vsel %vm93_vm3, %v71_v24, %v87_v23  ;;  %v587_v23 = vpack.c.bf16 %v353_v21, %v352_v19  ;;  %v355_v24 = vld [vmem:[#allocation8 + $0x18] sm:$0xff] }
  0xa4   :  { %v91_v27 = vpop.permute.xlu0 %90 }
  0xa5   :  { %v96_v28 = vsel %vm95_vm4, %v94_v26, %v91_v27  ;;  %v356_v26 = vld [vmem:[#allocation8 + $0x20] sm:$0xff] }
  0xa6   :  { %526 = vmatmul.mubr.msk.f32.vlgmr.msra.gmra.mrb[0].mxu0 %vm105_vm5, %v96_v28 }
  0xa7   :  { %v478_v25 = vld [vmem:[#allocation4] ss:$0 sm:$0xff]  ;;  %559 = vmatprep.mubr.msk.f32.mxu0 %vm673_vm1, %v674_v7  ;;  %588 = vmatpush3.bf16.msra.mxu0 %v587_v23 }
  0xa8   :  { %191 = vrot.lane.b32.xlu0 %v478_v25, %s678_s23  ;;  %v590_v25 = vpack.c.bf16 %v355_v24, %v354_v22  ;;  %589 = vmatprep.subr.bf16.mxu0 %v672_v1 }
  0xab   :  { %591 = vmatpush3.bf16.msra.mxu0 %v590_v25 }
  0xac   :  { %59 = vrot.lane.b32.xlu0 %v744_v11, %s679_s0  ;;  %557 = vmatprep.subr.mxu0 %v674_v7 }
  0xaf   :  { %558 = vmatpush3.msra.mxu0 %v356_v26 }
 0x11a   :  { %v192_v38 = vpop.permute.xlu0 %191 }
 0x11e   :  { %v60_v39 = vpop.permute.xlu0 %59 }
 0x11f   :  { %62 = vst.msk [vmem:[#allocation3] sm:$0x1] %vm52_vm0, %v60_v39 }
 0x126   :  { %v479_v53 = vld [vmem:[#allocation3] ss:$0 sm:$0xff] }
 0x179   :  { %v175_v29 = vpop.f32.mrb[0].mxu0 }
 0x17a   :  { %604 = vtanh.f32 %v175_v29  ;;  %v527_v30 = vpop.f32.mrb[1].mxu0  ;;  %v477_v32 = vmul.f32 -1.442695, %v175_v29 }
 0x17c   :  { %606 = vpow2.f32 %v477_v32 }
 0x184   :  { %v605_v31 = vpop.eup %604 }
 0x185   :  { %196 = vrot.lane.b32.xlu1 %v605_v31, %s675_s1 }
 0x186   :  { %v607_v33 = vpop.eup %606 }
 0x187   :  { %v182_v34 = vadd.f32 1.0, %v607_v33 }
 0x189   :  { %608 = vrcp.f32 %v182_v34 }
 0x193   :  { %v609_v35 = vpop.eup %608 }
 0x194   :  { %v194_v40 = vmul.f32 %v609_v35, %v192_v38 }
 0x1f7   :  { %v197_v36 = vpop.permute.xlu1 %196 }
 0x1f8   :  { %v199_v37 = vmul.f32 %v609_v35, %v197_v36 }
 0x1fa   :  { %201 = vrot.lane.b32.xlu1 %v199_v37, %s678_s23 }
 0x26c   :  { %v202_v41 = vpop.permute.xlu1 %201 }
 0x26d   :  { %v769_v42 = vadd.f32 %v202_v41, %v194_v40 }
 0x26f   :  { %610 = vtanh.f32 %v769_v42 }
 0x279   :  { %v611_v51 = vpop.eup %610 }
 0x27a   :  { %207 = vrot.lane.b32.xlu1 %v611_v51, %s675_s1 }
 0x27e   :  { %220 = vrot.lane.b32.xlu1 %v479_v53, %s678_s23 }
 0x282   :  { %67 = vrot.lane.b32.xlu1 %v744_v11, %s678_s23 }
 0x2ec   :  { %v208_v58 = vpop.permute.xlu1 %207 }
 0x2ed   :  { %v210_v59 = vmul.f32 %v609_v35, %v208_v58 }
 0x2ef   :  { %212 = vrot.lane.b32.xlu0 %v210_v59, %s678_s23 }
 0x2f0   :  { %v221_v60 = vpop.permute.xlu1 %220 }
 0x2f3   :  { %223 = vrot.lane.b32.xlu0 %v751_v20, %s675_s1 }
 0x2f4   :  { %v68_v61 = vpop.permute.xlu1 %67 }
 0x2f5   :  { %70 = vst.msk [vmem:[#allocation5] sm:$0x1] %vm52_vm0, %v68_v61 }
 0x2fc   :  { %v482_v62 = vld [vmem:[#allocation5] ss:$0 sm:$0xff] }
 0x2fd   :  { %324 = vrot.lane.b32.xlu1 %v482_v62, %s678_s23 }
 0x361   :  { %v213_v63 = vpop.permute.xlu0 %212 }
 0x362   :  { %433 = vst.msk [vmem:[#allocation2] sm:$0x1] %vm52_vm0, %v213_v63  ;;  %448 = vst.msk [vmem:[%s828_s5] sm:$0x1] %vm52_vm0, %v213_v63  ;;  %v227_v0 = vsel %vm226_vm6, %v213_v63, %v221_v60 }
 0x365   :  { %v224_v2 = vpop.permute.xlu0 %223 }
 0x366   :  { %v228_v3 = vsel %vm105_vm5, %v227_v0, %v224_v2 }
 0x367   :  { %547 = vmatmul.mubr.msk.f32.vlgmr.msra.gmra.mrb[0].mxu1 %vm238_vm7, %v228_v3 }
 0x36f   :  { %v325_v14 = vpop.permute.xlu1 %324 }
 0x43a   :  { %v308_v4 = vpop.f32.mrb[0].mxu1 }
 0x43b   :  { %612 = vtanh.f32 %v308_v4  ;;  %v548_v5 = vpop.f32.mrb[1].mxu1  ;;  %v481_v8 = vmul.f32 -1.442695, %v308_v4 }
 0x43d   :  { %614 = vpow2.f32 %v481_v8 }
 0x445   :  { %v613_v6 = vpop.eup %612 }
 0x446   :  { %329 = vrot.lane.b32.xlu0 %v613_v6, %s675_s1 }
 0x447   :  { %v615_v9 = vpop.eup %614 }
 0x448   :  { %v315_v10 = vadd.f32 1.0, %v615_v9 }
 0x44a   :  { %616 = vrcp.f32 %v315_v10 }
 0x454   :  { %v617_v11 = vpop.eup %616 }
 0x455   :  { %v327_v15 = vmul.f32 %v617_v11, %v325_v14 }
 0x4b8   :  { %v330_v12 = vpop.permute.xlu0 %329 }
 0x4b9   :  { %v332_v13 = vmul.f32 %v617_v11, %v330_v12 }
 0x4bb   :  { %334 = vrot.lane.b32.xlu0 %v332_v13, %s678_s23 }
 0x52d   :  { %v335_v16 = vpop.permute.xlu0 %334 }
 0x52e   :  { %v337_v17 = vadd.f32 %v335_v16, %v327_v15 }
 0x530   :  { %618 = vtanh.f32 %v337_v17 }
 0x53a   :  { %v619_v18 = vpop.eup %618 }
 0x53b   :  { %340 = vrot.lane.b32.xlu1 %v619_v18, %s675_s1 }
 0x53f   :  { %348 = vrot.lane.b32.xlu1 %v751_v20, %s678_s23 }
 0x543   :  { %454 = vrot.lane.b32.xlu1 %v769_v42, %s678_s23 }
 0x547   :  { %441 = vrot.lane.b32.xlu1 %v337_v17, %s679_s0 }
 0x5ad   :  { %v341_v27 = vpop.permute.xlu1 %340 }
 0x5ae   :  { %v343_v28 = vmul.f32 %v617_v11, %v341_v27 }
 0x5b0   :  { %345 = vrot.lane.b32.xlu0 %v343_v28, %s678_s23 }
 0x5b1   :  { %v349_v29 = vpop.permute.xlu1 %348 }
 0x5b4   :  { %436 = vrot.lane.b32.xlu0 %v769_v42, %s679_s0 }
 0x5b5   :  { %v455_v20 = vpop.permute.xlu1 %454 }
 0x5b8   :  { %449 = vrot.lane.b32.xlu0 %v343_v28, %s675_s1 }
 0x5b9   :  { %v442_v1 = vpop.permute.xlu1 %441 }
 0x5ba   :  { %444 = vst.msk [vmem:[#allocation5] sm:$0x1] %vm52_vm0, %v442_v1 }
 0x5bc   :  { %459 = vrot.lane.b32.xlu0 %v337_v17, %s675_s1 }
 0x622   :  { %v346_v7 = vpop.permute.xlu0 %345 }
 0x623   :  { %v351_v30 = vsel %vm226_vm6, %v346_v7, %v349_v29  ;;  %434 = vst.msk [vmem:[#allocation3] sm:$0x1] %vm52_vm0, %v346_v7 }
 0x624   :  { %560 = vmatmul.mubr.msk.f32.vlgmr.msra.gmra.mrb[2].mxu0 %vm357_vm8, %v351_v30 }
 0x626   :  { %v437_v31 = vpop.permute.xlu0 %436 }
 0x627   :  { %439 = vst.msk [vmem:[#allocation4] sm:$0x1] %vm52_vm0, %v437_v31 }
 0x62a   :  { %v450_v32 = vpop.permute.xlu0 %449 }
 0x62b   :  { %453 = vst.msk [vmem:[%s828_s5] sm:$0x1] %vm452_vm9, %v450_v32 }
 0x62c   :  { %458 = vst.msk [vmem:[%s828_s5] sm:$0x1] %vm457_vm10, %v455_v20 }
 0x62e   :  { %v460_v33 = vpop.permute.xlu0 %459 }
 0x62f   :  { %463 = vst.msk [vmem:[%s828_s5] sm:$0x1] %vm462_vm11, %v460_v33 }
 0x6f7   :  { %v427_v34 = vpop.f32.mrb[2].mxu0 }
 0x6f8   :  { %431 = vst [vmem:[%s827_s4] sm:$0x1] %v427_v34  ;;  %v561_v35 = vpop.f32.mrb[3].mxu0 }
 0x6f9   :  { %472 = vsyncpa [#allocation7], 1 }
 0x6fa   :  { %473 = vsyncpa [#allocation9], 1 }

</bundles_post_ra>
